<compile_context>
chip_gen: v6e
topology: v6e:2x2x1
jax: 0.10.0
libtpu: 0.0.40
codegen_flags: <defaults>
</compile_context>

<pallas_src>
import math

import jax
import jax.numpy as jnp
from jax.experimental import pallas as pl
from jax.experimental.pallas import tpu as pltpu


# 48 MiB scoped VMEM is safe on every generation (v7x has 64 MiB physical per
# TensorCore).  Headroom is spent on tile size, not on raising this limit.
_VMEM_LIMIT = 48 * 1024 * 1024


def _tile(n, pref):
    """Largest power-of-two-ish tile <= pref that divides n; fall back to n."""
    t = pref
    while t >= 128:
        if n % t == 0:
            return t
        t //= 2
    return n


# ----------------------------- Tiled linear ----------------------------------
def _linear_kernel(x_ref, wt_ref, b_ref, o_ref, acc_ref):
    kk = pl.program_id(2)

    @pl.when(kk == 0)
    def _():
        acc_ref[...] = jnp.zeros_like(acc_ref)

    # native-dtype (bf16) operands, f32 accumulation on the MXU
    acc_ref[...] += jnp.dot(x_ref[...], wt_ref[...],
                            preferred_element_type=jnp.float32)

    @pl.when(kk == pl.num_programs(2) - 1)
    def _():
        o_ref[...] = (acc_ref[...] + b_ref[...]).astype(o_ref.dtype)


def linear(x, wt, b, *, out_dtype=None, tm=256, tn=256, tk=512):
    """y = x @ wt + b, with wt already laid out (Din, Dout) at init time."""
    S, Din = x.shape
    Dout = wt.shape[1]
    out_dtype = out_dtype or x.dtype
    b2 = b.reshape(1, Dout).astype(jnp.float32)
    tm = _tile(S, tm)
    tn = _tile(Dout, tn)
    tk = _tile(Din, tk)
    return pl.pallas_call(
        _linear_kernel,
        out_shape=jax.ShapeDtypeStruct((S, Dout), out_dtype),
        grid=(S // tm, Dout // tn, Din // tk),
        in_specs=[
            pl.BlockSpec((tm, tk), lambda i, j, kk: (i, kk)),
            pl.BlockSpec((tk, tn), lambda i, j, kk: (kk, j)),
            pl.BlockSpec((1, tn), lambda i, j, kk: (0, j)),
        ],
        out_specs=pl.BlockSpec((tm, tn), lambda i, j, kk: (i, j)),
        scratch_shapes=[pltpu.VMEM((tm, tn), jnp.float32)],
        compiler_params=pltpu.CompilerParams(
            dimension_semantics=("parallel", "parallel", "arbitrary"),
            vmem_limit_bytes=_VMEM_LIMIT),
    )(x, wt, b2)


# ------------------- Flash attention + fused RoPE + tile skip -----------------
def _rope_mul(x_f32, cos, sin_signed):
    """x*cos + rotate_half(x)*sin, with rotate_half's sign folded into sin_signed.

    rotate_half(x) = cat(-x2, x1); we build cat(x2, x1) and multiply by
    sin_signed = cat(-sin, sin).
    """
    half = x_f32.shape[-1] // 2
    rot = jnp.concatenate([x_f32[:, half:], x_f32[:, :half]], axis=-1)
    # TODO(synk): pltpu.roll(x_f32, shift=half, axis=1) avoids the concatenate
    # copy on real hardware; concat kept for interpret-mode portability.
    return x_f32 * cos + rot * sin_signed


def _flash_kernel(kv_lo_ref, kv_hi_ref,
                  q_ref, k_ref, v_ref,
                  cosq_ref, sinq_ref, cosk_ref, sink_ref,
                  segq_ref, segk_ref,
                  o_ref,
                  q_sc, m_sc, l_sc, acc_sc):
    qi = pl.program_id(1)
    ki = pl.program_id(2)
    lo = kv_lo_ref[qi]
    hi = kv_hi_ref[qi]

    @pl.when(ki == 0)
    def _():
        m_sc[...] = jnp.full_like(m_sc, -1e30)
        l_sc[...] = jnp.zeros_like(l_sc)
        acc_sc[...] = jnp.zeros_like(acc_sc)
        # RoPE on the q tile, once per (head, q-tile); 1/sqrt(head_dim) is folded
        # into cosq/sinq so the score tile is never rescaled.
        qf = q_ref[...].astype(jnp.float32)
        q_sc[...] = _rope_mul(qf, cosq_ref[...], sinq_ref[...]).astype(q_sc.dtype)

    # Skip kv tiles that cannot overlap this q-tile's segments (block-diag mask).
    @pl.when((ki >= lo) & (ki <= hi))
    def _():
        kf = k_ref[...].astype(jnp.float32)
        k_rope = _rope_mul(kf, cosk_ref[...], sink_ref[...]).astype(k_ref.dtype)

        # (tq, hd) @ (tk, hd)^T on the MXU, f32 accumulation
        s = jax.lax.dot_general(q_sc[...], k_rope, (((1,), (1,)), ((), ())),
                                preferred_element_type=jnp.float32)

        # block-diagonal mask built in-kernel from per-token segment ids —
        # the (S, S) mask is never materialized.
        s = jnp.where(segq_ref[...] == segk_ref[...], s, jnp.float32(-1e30))

        m_prev = m_sc[...]
        m_new = jnp.maximum(m_prev, s.max(axis=-1, keepdims=True))
        alpha = jnp.exp(m_prev - m_new)
        p = jnp.exp(s - m_new)
        l_sc[...] = alpha * l_sc[...] + p.sum(axis=-1, keepdims=True)
        acc_sc[...] = alpha * acc_sc[...] + jnp.dot(
            p.astype(v_ref.dtype), v_ref[...], preferred_element_type=jnp.float32)
        m_sc[...] = m_new

    @pl.when(ki == pl.num_programs(2) - 1)
    def _():
        inv_l = 1.0 / l_sc[...]        # (tq, 1) — negligible, kept exact
        o_ref[...] = (acc_sc[...] * inv_l).astype(o_ref.dtype)


def flash_attention(qkv, cos_q, sin_q, cos_k, sin_k, seg_col, seg_row,
                    kv_lo, kv_hi, num_heads, head_dim, *,
                    out_dtype, tq=128, tk=256):
    """qkv: (S, 3*dim) fused projection buffer; q/k/v are read as column views.

    Output is written directly as (S, dim) (lane-dense stores, no relayout).
    """
    S = qkv.shape[0]
    H, hd = num_heads, head_dim
    dim = H * hd
    tq = _tile(S, tq)
    tk = _tile(S, tk)

    def kv_blk(ki, qi, lo_ref, hi_ref):
        # Clamp so skipped steps map to an already-resident block (no re-DMA).
        return jnp.clip(ki, lo_ref[qi], hi_ref[qi])

    return pl.pallas_call(
        _flash_kernel,
        out_shape=jax.ShapeDtypeStruct((S, dim), out_dtype),
        grid_spec=pltpu.PrefetchScalarGridSpec(
            num_scalar_prefetch=2,
            grid=(H, S // tq, S // tk),
            in_specs=[
                # q / k / v column views into the (S, 3*dim) qkv buffer
                pl.BlockSpec((tq, hd), lambda h, qi, ki, lo, hi: (qi, h)),
                pl.BlockSpec((tk, hd),
                             lambda h, qi, ki, lo, hi: (kv_blk(ki, qi, lo, hi), H + h)),
                pl.BlockSpec((tk, hd),
                             lambda h, qi, ki, lo, hi: (kv_blk(ki, qi, lo, hi), 2 * H + h)),
                # rotary tables (q-side tables carry the 1/sqrt(hd) scale)
                pl.BlockSpec((tq, hd), lambda h, qi, ki, lo, hi: (qi, 0)),
                pl.BlockSpec((tq, hd), lambda h, qi, ki, lo, hi: (qi, 0)),
                pl.BlockSpec((tk, hd),
                             lambda h, qi, ki, lo, hi: (kv_blk(ki, qi, lo, hi), 0)),
                pl.BlockSpec((tk, hd),
                             lambda h, qi, ki, lo, hi: (kv_blk(ki, qi, lo, hi), 0)),
                # per-token segment ids for the boundary-tile mask
                pl.BlockSpec((tq, 1), lambda h, qi, ki, lo, hi: (qi, 0)),
                pl.BlockSpec((1, tk),
                             lambda h, qi, ki, lo, hi: (0, kv_blk(ki, qi, lo, hi))),
            ],
            out_specs=pl.BlockSpec((tq, hd), lambda h, qi, ki, lo, hi: (qi, h)),
            scratch_shapes=[
                pltpu.VMEM((tq, hd), qkv.dtype),   # roped + scaled q tile
                pltpu.VMEM((tq, 1), jnp.float32),  # running max
                pltpu.VMEM((tq, 1), jnp.float32),  # running denom
                pltpu.VMEM((tq, hd), jnp.float32), # output accumulator
            ]),
        compiler_params=pltpu.CompilerParams(
            # TODO(synk): on v7x mark the head axis pltpu.CORE_PARALLEL to use
            # both TensorCores; plain strings kept here for portability.
            dimension_semantics=("parallel", "parallel", "arbitrary"),
            vmem_limit_bytes=_VMEM_LIMIT),
    )(kv_lo, kv_hi, qkv, qkv, qkv, cos_q, sin_q, cos_k, sin_k, seg_col, seg_row)


# ------------------------------ Full forward ----------------------------------
def prepare_weights(qkv_w, qkv_b, proj_w, proj_b, compute_dtype=jnp.bfloat16):
    """One-time (init) weight prep: pre-transpose to (Din, Dout) and cast MXU
    operands to bf16; biases stay f32."""
    return (qkv_w.T.astype(compute_dtype), qkv_b.astype(jnp.float32),
            proj_w.T.astype(compute_dtype), proj_b.astype(jnp.float32))


def vision_attention(hidden_states, cu_seqlens, rotary_pos_emb,
                     qkv_wt, qkv_b, proj_wt, proj_b, num_heads,
                     *, compute_dtype=jnp.bfloat16, tq=128, tk=256):
    S, dim = hidden_states.shape
    head_dim = dim // num_heads
    H = num_heads
    assert head_dim % 128 == 0, "direct qkv-buffer views need head_dim % 128 == 0"
    # TODO(synk): for head_dim not a multiple of 128 (e.g. Qwen2-VL's 80) fall
    # back to an explicit (H, S, hd) relayout or pad head_dim to 128.
    out_dtype = hidden_states.dtype

    x = hidden_states.astype(compute_dtype)

    # fused qkv projection -> (S, 3*dim) in compute dtype; the flash kernel reads
    # q/k/v straight out of this buffer (no relayout pass).
    qkv = linear(x, qkv_wt, qkv_b, out_dtype=compute_dtype)

    # rotary tables (S, head_dim), f32; rotate_half's sign and 1/sqrt(head_dim)
    # are folded in once here so the kernel does no sign/scale work.
    scale = 1.0 / math.sqrt(head_dim)
    cos = jnp.tile(jnp.cos(rotary_pos_emb), (1, 2)).astype(jnp.float32)
    sin_half = jnp.sin(rotary_pos_emb).astype(jnp.float32)
    sin_signed = jnp.concatenate([-sin_half, sin_half], axis=-1)
    cos_q = cos * scale
    sin_q = sin_signed * scale

    # per-token segment ids + per-q-tile valid kv-tile range (scalar prefetch)
    tq_ = _tile(S, tq)
    tk_ = _tile(S, tk)
    seg = jnp.searchsorted(cu_seqlens[1:], jnp.arange(S),
                           side="right").astype(jnp.int32)
    seg_q_tiles = seg.reshape(S // tq_, tq_)
    seg_k_tiles = seg.reshape(S // tk_, tk_)
    q_min, q_max = seg_q_tiles[:, 0], seg_q_tiles[:, -1]
    k_min, k_max = seg_k_tiles[:, 0], seg_k_tiles[:, -1]
    kv_lo = jnp.searchsorted(k_max, q_min, side="left").astype(jnp.int32)
    kv_hi = (jnp.searchsorted(k_min, q_max, side="right") - 1).astype(jnp.int32)

    attn = flash_attention(qkv, cos_q, sin_q, cos, sin_signed,
                           seg.reshape(S, 1), seg.reshape(1, S),
                           kv_lo, kv_hi, H, head_dim,
                           out_dtype=compute_dtype, tq=tq_, tk=tk_)   # (S, dim)

    # output projection
    return linear(attn, proj_wt, proj_b, out_dtype=out_dtype)


# ------------------------------ Pure-JAX reference ----------------------------
def _reference(hidden_states, cu_seqlens, rotary_pos_emb,
               qkv_w, qkv_b, proj_w, proj_b, num_heads):
    with jax.default_matmul_precision("highest"):
        S, dim = hidden_states.shape
        head_dim = dim // num_heads
        qkv = hidden_states @ qkv_w.T + qkv_b
        qkv = qkv.reshape(S, 3, num_heads, head_dim).transpose(1, 0, 2, 3)
        q, k, v = qkv[0], qkv[1], qkv[2]                         # (S, H, hd)

        cos = jnp.tile(jnp.cos(rotary_pos_emb), (1, 2))[:, None, :]
        sin = jnp.tile(jnp.sin(rotary_pos_emb), (1, 2))[:, None, :]

        def rot_half(x):
            h = x.shape[-1] // 2
            return jnp.concatenate([-x[..., h:], x[..., :h]], axis=-1)

        q = q * cos + rot_half(q) * sin
        k = k * cos + rot_half(k) * sin

        seg = jnp.searchsorted(cu_seqlens[1:], jnp.arange(S), side="right")
        mask = jnp.where(seg[:, None] == seg[None, :], 0.0,
                         jnp.finfo(jnp.float32).min)

        q = q.transpose(1, 0, 2)
        k = k.transpose(1, 0, 2)
        v = v.transpose(1, 0, 2)
        w = jnp.einsum("hqd,hkd->hqk", q, k) / math.sqrt(head_dim) + mask[None]
        w = jax.nn.softmax(w.astype(jnp.float32), axis=-1)
        o = jnp.einsum("hqk,hkd->hqd", w, v).transpose(1, 0, 2).reshape(S, dim)
        return o @ proj_w.T + proj_b


# ----------------------------------- Main --------------------------------------
if __name__ == "__main__":
    # (8,128)-aligned shapes that exercise the multi-tile grid, the cross-tile
    # segment boundary, and the fully-masked-kv-tile skip path.
    dim, num_heads, seq = 256, 2, 512
    head_dim = dim // num_heads                                   # 128

    key = jax.random.PRNGKey(0)
    k1, k2, k3, k4, k5, k6 = jax.random.split(key, 6)

    hidden_states = jax.random.normal(k1, (seq, dim), jnp.float32)
    qkv_w = 0.05 * jax.random.normal(k2, (3 * dim, dim), jnp.float32)
    qkv_b = 0.05 * jax.random.normal(k3, (3 * dim,), jnp.float32)
    proj_w = 0.05 * jax.random.normal(k4, (dim, dim), jnp.float32)
    proj_b = 0.05 * jax.random.normal(k5, (dim,), jnp.float32)
    rotary_pos_emb = jax.random.normal(k6, (seq, head_dim // 2), jnp.float32)
    cu_seqlens = jnp.array([0, 192, 512], dtype=jnp.int32)   # boundary inside a tile

    # init-time weight prep (pre-transpose + bf16 cast) — done once, not per call
    qkv_wt, qkv_b32, proj_wt, proj_b32 = prepare_weights(qkv_w, qkv_b, proj_w, proj_b)

    out = vision_attention(hidden_states, cu_seqlens, rotary_pos_emb,
                           qkv_wt, qkv_b32, proj_wt, proj_b32, num_heads)
    out = jax.block_until_ready(out)

    ref = _reference(hidden_states, cu_seqlens, rotary_pos_emb,
                     qkv_w, qkv_b, proj_w, proj_b, num_heads)
    assert out.shape == (seq, dim)
    max_diff = float(jnp.max(jnp.abs(out - ref)))
    # bf16 MXU operands (per perf review) -> 2e-2 tolerance vs the f32 reference.
    assert jnp.allclose(out, ref, atol=2e-2, rtol=2e-2), \
        f"mismatch vs reference (max abs diff {max_diff})"
    print("KERNEL_OK")
</pallas_src>

<mosaic_0001>
module attributes {stable_mosaic.version = 11 : i64} {
  func.func @_linear_kernel(%arg0: i32, %arg1: i32, %arg2: i32, %arg3: memref<256x256xbf16, #tpu.memory_space<vmem>>, %arg4: memref<256x256xbf16, #tpu.memory_space<vmem>>, %arg5: memref<1x256xf32, #tpu.memory_space<vmem>>, %arg6: memref<256x256xbf16, #tpu.memory_space<vmem>>, %arg7: memref<256x256xf32, #tpu.memory_space<vmem>>) attributes {dimension_semantics = [#tpu.dimension_semantics<parallel>, #tpu.dimension_semantics<parallel>, #tpu.dimension_semantics<arbitrary>], iteration_bounds = array<i64: 2, 3, 1>, scalar_prefetch = 0 : i64, scratch_operands = 1 : i64, tpu.core_type = #tpu.core_type<tc>, window_params = [{transform_indices = @transform_0, window_bounds = array<i64: 256, 256>}, {transform_indices = @transform_1, window_bounds = array<i64: 256, 256>}, {transform_indices = @transform_2, window_bounds = array<i64: 1, 256>}, {transform_indices = @transform_3, window_bounds = array<i64: 256, 256>}]} {
    %c0_i32 = arith.constant 0 : i32
    %0 = arith.cmpi eq, %arg2, %c0_i32 : i32
    %1 = arith.extui %0 : i1 to i32
    %c0_i32_0 = arith.constant 0 : i32
    %2 = arith.cmpi ne, %1, %c0_i32_0 : i32
    scf.if %2 {
      %cst_10 = arith.constant 0.000000e+00 : f32
      %12 = vector.broadcast %cst_10 : f32 to vector<256x256xf32>
      %c0_11 = arith.constant 0 : index
      %c0_12 = arith.constant 0 : index
      %13 = vector.load %arg7[%c0_11, %c0_12] : memref<256x256xf32, #tpu.memory_space<vmem>>, vector<256x256xf32>
      tpu.vector_store %arg7[%c0_11, %c0_12], %12 {strides = array<i32>} : memref<256x256xf32, #tpu.memory_space<vmem>>, vector<256x256xf32>,
    } else {
    }
    %c0 = arith.constant 0 : index
    %c0_1 = arith.constant 0 : index
    %3 = vector.load %arg7[%c0, %c0_1] : memref<256x256xf32, #tpu.memory_space<vmem>>, vector<256x256xf32>
    %c0_2 = arith.constant 0 : index
    %c0_3 = arith.constant 0 : index
    %4 = vector.load %arg3[%c0_2, %c0_3] : memref<256x256xbf16, #tpu.memory_space<vmem>>, vector<256x256xbf16>
    %c0_4 = arith.constant 0 : index
    %c0_5 = arith.constant 0 : index
    %5 = vector.load %arg4[%c0_4, %c0_5] : memref<256x256xbf16, #tpu.memory_space<vmem>>, vector<256x256xbf16>
    %cst = arith.constant dense<0.000000e+00> : vector<256x256xf32>
    %6 = tpu.matmul %4, %5, %cst {dimension_numbers = #tpu.dot_dimension_numbers<[1], [0], [0], [1], [0, 0, 1, 1], [], []>} : vector<256x256xbf16>, vector<256x256xbf16>, vector<256x256xf32> -> vector<256x256xf32>
    %7 = arith.addf %3, %6 : vector<256x256xf32>
    %c0_6 = arith.constant 0 : index
    %c0_7 = arith.constant 0 : index
    %8 = vector.load %arg7[%c0_6, %c0_7] : memref<256x256xf32, #tpu.memory_space<vmem>>, vector<256x256xf32>
    tpu.vector_store %arg7[%c0_6, %c0_7], %7 {strides = array<i32>} : memref<256x256xf32, #tpu.memory_space<vmem>>, vector<256x256xf32>,
    %c0_i32_8 = arith.constant 0 : i32
    %9 = arith.cmpi eq, %arg2, %c0_i32_8 : i32
    %10 = arith.extui %9 : i1 to i32
    %c0_i32_9 = arith.constant 0 : i32
    %11 = arith.cmpi ne, %10, %c0_i32_9 : i32
    scf.if %11 {
      %c0_10 = arith.constant 0 : index
      %c0_11 = arith.constant 0 : index
      %12 = vector.load %arg7[%c0_10, %c0_11] : memref<256x256xf32, #tpu.memory_space<vmem>>, vector<256x256xf32>
      %c0_12 = arith.constant 0 : index
      %c0_13 = arith.constant 0 : index
      %13 = vector.load %arg5[%c0_12, %c0_13] : memref<1x256xf32, #tpu.memory_space<vmem>>, vector<1x256xf32>
      %14 = vector.broadcast %13 : vector<1x256xf32> to vector<256x256xf32>
      %15 = arith.addf %12, %14 : vector<256x256xf32>
      %16 = arith.truncf %15 : vector<256x256xf32> to vector<256x256xbf16>
      %c0_14 = arith.constant 0 : index
      %c0_15 = arith.constant 0 : index
      %17 = vector.load %arg6[%c0_14, %c0_15] : memref<256x256xbf16, #tpu.memory_space<vmem>>, vector<256x256xbf16>
      tpu.vector_store %arg6[%c0_14, %c0_15], %16 {strides = array<i32>} : memref<256x256xbf16, #tpu.memory_space<vmem>>, vector<256x256xbf16>,
    } else {
    }
    return
  }
  func.func @transform_0(%arg0: i32, %arg1: i32, %arg2: i32) -> (i32, i32) {
    %c0_i32 = arith.constant 0 : i32
    return %arg0, %arg2 : i32, i32
  }
  func.func @transform_1(%arg0: i32, %arg1: i32, %arg2: i32) -> (i32, i32) {
    %c0_i32 = arith.constant 0 : i32
    return %arg2, %arg1 : i32, i32
  }
  func.func @transform_2(%arg0: i32, %arg1: i32, %arg2: i32) -> (i32, i32) {
    %c0_i32 = arith.constant 0 : i32
    %c0_i32_0 = arith.constant 0 : i32
    return %c0_i32, %arg1 : i32, i32
  }
  func.func @transform_3(%arg0: i32, %arg1: i32, %arg2: i32) -> (i32, i32) {
    %c0_i32 = arith.constant 0 : i32
    return %arg0, %arg1 : i32, i32
  }
}

</mosaic_0001>

<bundles_post_ra>
// kernel: tpu_custom_call.1
= control target key start
LH: loop header
LB: loop body
LE: loop exit
PB: predicated region body
PF: predicated region fallthrough
CT: control target
= control target key end

     0   :  { %s2855_s0 = inlined_call_operand.hbm [shape: bf16[512,256], index: 0, kind: input, shape index: {}]   ;;  %s2856_s1 = inlined_call_operand.hbm [shape: bf16[256,768], index: 1, kind: input, shape index: {}]   ;;  %s2857_s2 = inlined_call_operand.hbm [shape: f32[1,768], index: 2, kind: input, shape index: {}]   ;;  %s2858_s3 = inlined_call_operand.hbm [shape: bf16[512,768], index: 3, kind: output, shape index: {}]  }
   0x1   :  { %2871 = sst [smem:[#allocation24_spill]] %s2856_s1 }
   0x2   :  { %2872 = sst [smem:[#allocation25_spill]] %s2858_s3 }
   0x3   :  { %8 = vsyncpa [#allocation4], 0 }
   0x4   :  { %10 = vsyncpa [#allocation4 + $0x1], 0 }
   0x5   :  { %11 = vsyncpa [#allocation7], 0 }
   0x6   :  { %13 = vsyncpa [#allocation7 + $0x1], 0 }
   0x7   :  { %14 = vsyncpa [#allocation5], 0 }
   0x8   :  { %16 = vsyncpa [#allocation5 + $0x1], 0  ;;  %s2355_s12 = smov 0   ;;  %s2357_s13 = smov 0  }
   0x9   :  { %s2359_s14 = smov 0   ;;  %s2361_s15 = smov 0  }
   0xa   :  { %s2363_s16 = smov 0   ;;  %s2365_s17 = smov 0  }
   0xb   :  { %s2367_s18 = smov 0   ;;  %s2369_s19 = smov 0  }
   0xc   :  { %s2371_s20 = smov 0   ;;  %s2373_s21 = smov 0  }
   0xd   :  { %s2375_s22 = smov 0   ;;  %s2377_s23 = smov 0  }
   0xe   :  { %s2379_s24 = smov 0   ;;  %s2381_s25 = smov 0  }
   0xf LB: > { %2873 = sst [smem:[#allocation13_spill]] %s2271_s12  ;;  %s37_s26 = sadd.s32 1, %s2315_s23  ;;  %s2323_s25 = sphi %s2381_s25, %s22_s25   ;;  %s2319_s24 = sphi %s2379_s24, %s2925_s24   ;;  %s2315_s23 = sphi %s2377_s23, %s2924_s23   ;;  %s2311_s22 = sphi %s2375_s22, %s2923_s22   ;;  %s2307_s21 = sphi %s2373_s21, %s2922_s21   ;;  %s2303_s20 = sphi %s2371_s20, %s2912_s20   ;;  %s2299_s19 = sphi %s2369_s19, %s2921_s19   ;;  %s2295_s18 = sphi %s2367_s18, %s2920_s18   ;;  %s2291_s17 = sphi %s2365_s17, %s2919_s17   ;;  %s2287_s16 = sphi %s2363_s16, %s2918_s16   ;;  %s2283_s15 = sphi %s2361_s15, %s2917_s15   ;;  %s2279_s14 = sphi %s2359_s14, %s2909_s14   ;;  %s2275_s13 = sphi %s2357_s13, %s2916_s13   ;;  %s2271_s12 = sphi %s2355_s12, %s2915_s12  }
  0x10   : > { %2874 = sst [smem:[#allocation14_spill]] %s2279_s14  ;;  %p58_p0 = scmp.eq.s32.totalorder %s2323_s25, 0 }
  0x11   : > { %2875 = sst [smem:[#allocation15_spill]] %s2303_s20  ;;  %p2429_p1 = scmp.ge.s32.totalorder %s37_s26, 3 }
  0x12   : > { %2876 = sst [smem:[#allocation16_spill]] %s2307_s21  ;;  %p85_p2 = scmp.ne.s32.totalorder %s2291_s17, %s2287_s16 }
  0x13   : > { %2877 = sst [smem:[#allocation17_spill]] %s2311_s22  ;;  %p91_p3 = scmp.ne.s32.totalorder %s2287_s16, %s2283_s15 }
  0x14   : > { %p1875_p4 = scmp.lt.s32.totalorder %s2323_s25, 6  ;;  %p87_p5 = por %p85_p2, %p58_p0 }
  0x15   : > { %s193_s29 = sand.u32 1, %s2323_s25   ;;  %s2859_s30 = sand.u32 1, %s2291_s17  }
  0x16   : > { %s1670_s4 = sshll.u32 %s2859_s30, 8  ;;  %s1786_s5 = sshll.u32 %s2315_s23, 7 }
  0x17   : > { %s2879_s1 = sld [smem:[#allocation24_spill]]  ;;  %s197_s9 = scalar_lea.vmem [#allocation6], %s1670_s4 }
  0x18   : > { %s207_s10 = sshll.u32 %s197_s9, 4  ;;  %p2451_p6 = pnand %p1875_p4, %p87_p5  ;;  %s208_s10 = int_to_ptr.vmem [resolvable:$true] %s207_s10 }
  0x19   : > { %p1676_p7 = scmp.ge.s32.totalorder %s2323_s25, 1  ;;  %s2456_s28 = scalar_lea.sflag [#allocation7], %s193_s29 }
  0x1a   : > { %p2865_p8 = pneg %p2451_p6  ;;  %s2104_s30 = scalar_lea.vmem %s208_s10, 4096 }
  0x1b   : > { %p2105_p9 = scmp.ne.s32.totalorder %s208_s10, %s2104_s30  ;;  %s2325_s4 = smov [#allocation6]  }
  0x1d   : > { %s206_s8 = scalar_lea.hbm %s2879_s1, %s1786_s5  ;;  %p2107_p10 = pnand %p2105_p9, %p2865_p8 }
  0x1e   : > { %s2109_s5 = sshll.u32 %s2325_s4, 4  ;;  %s2110_s5 = int_to_ptr.vmem [resolvable:$false] %s2109_s5 }
  0x1f   : > { %p2108_p11 = pneg %p2107_p10  ;;  %s2111_s6 = scalar_lea.vmem %s2110_s5, 8192 }
  0x20   : > { %p2112_p12 = scmp.lt.s32.totalorder %s208_s10, %s2110_s5  ;;  %p2113_p13 = scmp.lt.s32.totalorder %s2111_s6, %s2104_s30 }
  0x22   : > { %p2114_p2 = por %p2113_p13, %p2112_p12 }
  0x24   : > { %p2115_p5 = pnand %p2114_p2, %p2108_p11 }
  0x26   : > { %2118 = shalt.err (!%p2115_p5)
}
  0x27   : > { %s2326_s7 = smov 384   ;;  %s2860_s29 = smov 128  }
  0x28   : > { %s2861_s30 = smov 8   ;;  %p234_p9 = scmp.lt.s32.totalorder %s2323_s25, 7 }
  0x29   : > { %1867 = dma.hbm_to_vmem [thread:$0]  (!%p2451_p6), %s206_s8, 4096, %s208_s10, %s2456_s28, %s2326_s7, %s2860_s29, %s2861_s30  }
  0x2a   : > { %p2471_p10 = pnand %p1676_p7, %p234_p9  ;;  %s2476_s4 = sadd.s32 4294967295, %s2323_s25  }
  0x2b   : > { %s1663_s5 = sadd.s32 4294967294, %s2323_s25   ;;  %s2927_s26 = smov (%p2429_p1, %s37_s26), 0 }
  0x2c   : > { %2882 = sst [smem:[#allocation18_spill]] %s2927_s26  ;;  %s41_s6 = sadd.s32 1, %s2319_s24 }
  0x2d   : > { %s50_s8 = sadd.s32 1, %s2303_s20  ;;  %s2929_s6 = smov (!%p2429_p1, %s41_s6), %s2319_s24 }
  0x2e   : > { %p57_p7 = scmp.ne.s32.totalorder %s2303_s20, %s2299_s19  ;;  %p63_p11 = scmp.ne.s32.totalorder %s2299_s19, %s2295_s18 }
  0x2f   : > { %p43_p12 = scmp.ge.s32.totalorder %s2929_s6, 2  ;;  %p64_p13 = scmp.eq.s32.totalorder %s2476_s4, 0 }
  0x30   : > { %p2497_p2 = por %p58_p0, %p57_p7  ;;  %s74_s7 = ssub.s32 %s2315_s23, %s2927_s26 }
  0x31   : > { %s2931_s6 = smov (%p43_p12, %s2929_s6), 0  ;;  %p2505_p1 = por %p64_p13, %p63_p11 }
  0x32   : > { %2884 = sst [smem:[#allocation19_spill]] %s2931_s6  ;;  %p76_p5 = scmp.eq.s32.totalorder %s74_s7, 0 }
  0x33   : > { %s45_s18 = ssub.s32 %s2319_s24, %s2931_s6  ;;  %p2514_p9 = por %p91_p3, %p64_p13 }
  0x34   : > { %p48_p0 = scmp.eq.s32.totalorder %s45_s18, 0  ;;  %s129_s30 = sor.u32 %s74_s7, %s45_s18 }
  0x35   : > { %s2887_s1 = sadd.s32 1, %s2291_s17  ;;  %p130_p7 = scmp.eq.s32.totalorder %s129_s30, 0 }
  0x36   : > { %s2521_s26 = scalar_select %p76_p5, %s2291_s17, %s2887_s1  }
  0x37   : > { %s2524_s3 = scalar_select %p48_p0, %s2303_s20, %s50_s8  }
  0x38   : > { %2888 = sst [smem:[#allocation20_spill]] %s2521_s26  ;;  %s132_s21 = sadd.s32 1, %s2279_s14 }
  0x39   : > { %2889 = sst [smem:[#allocation21_spill]] %s2524_s3  ;;  %p142_p11 = scmp.ne.s32.totalorder %s2279_s14, %s2275_s13 }
  0x3a   : > { %p143_p12 = scmp.eq.s32.totalorder %s2476_s4, 5  ;;  %p148_p13 = scmp.ne.s32.totalorder %s2275_s13, %s2271_s12 }
  0x3b   : > { %s2531_s15 = scalar_select %p130_p7, %s2279_s14, %s132_s21  }
  0x3c   : > { %p2533_p3 = por %p143_p12, %p142_p11  ;;  %p149_p8 = scmp.eq.s32.totalorder %s1663_s5, 5 }
  0x3d   : > { %2890 = sst [smem:[#allocation22_spill]] %s2531_s15  ;;  %s169_s1 = sand.u32 1, %s2303_s20  }
  0x3e   : > { %s2891_s6 = scalar_select %p2533_p3, 1, 0 }
  0x3f   : > { %s1666_s7 = sshll.u32 %s169_s1, 8  ;;  %p2540_p5 = por %p149_p8, %p148_p13 }
  0x40   : > { %s1785_s30 = sshll.u32 %s2319_s24, 12  ;;  %s173_s18 = scalar_lea.vmem [#allocation3], %s1666_s7 }
  0x41   : > { %s2892_s8 = scalar_select %p2540_p5, 1, 0 }
  0x42   : > { %s183_s3 = sshll.u32 %s173_s18, 4  ;;  %s182_s21 = scalar_lea.hbm %s2855_s0, %s1785_s30  ;;  %s184_s3 = int_to_ptr.vmem [resolvable:$true] %s183_s3 }
  0x43   : > { %2893 = sst [smem:[#allocation23_spill]] %s2892_s8  ;;  %p2552_p0 = pnand %p1875_p4, %p2497_p2 }
  0x44   : > { %s2895_s5 = sand.u32 1, %s2291_s17   ;;  %s1787_s14 = sshll.u32 %s2315_s23, 5 }
  0x45   : > { %s1673_s20 = sshll.u32 %s2895_s5, 1  ;;  %s2562_s7 = scalar_lea.hbm %s2857_s2, %s1787_s14 }
  0x46   : > { %s170_s18 = scalar_lea.sflag [#allocation4], %s169_s1  ;;  %p2121_p8 = pneg %p2552_p0 }
  0x47   : > { %s2132_s22 = scalar_lea.vmem %s184_s3, 4096  ;;  %s2329_s26 = smov [#allocation3]  }
  0x48   : > { %p2133_p7 = scmp.ne.s32.totalorder %s184_s3, %s2132_s22  ;;  %s2137_s10 = sshll.u32 %s2329_s26, 4  ;;  %s2138_s10 = int_to_ptr.vmem [resolvable:$false] %s2137_s10 }
  0x49   : > { %s2139_s30 = scalar_lea.vmem %s2138_s10, 8192  ;;  %p2140_p4 = scmp.lt.s32.totalorder %s184_s3, %s2138_s10 }
  0x4a   : > { %p2135_p11 = pnand %p2133_p7, %p2121_p8  ;;  %p2141_p2 = scmp.lt.s32.totalorder %s2139_s30, %s2132_s22 }
  0x4c   : > { %p2136_p12 = pneg %p2135_p11  ;;  %p2142_p13 = por %p2141_p2, %p2140_p4 }
  0x4e   : > { %p2143_p5 = pnand %p2142_p13, %p2136_p12 }
  0x50   : > { %2146 = shalt.err (!%p2143_p5)
}
  0x51   : > { %s2896_s12 = smov 8   ;;  %s2897_s14 = smov 128  }
  0x52   : > { %1864 = dma.hbm_to_vmem [thread:$0]  (!%p2552_p0), %s182_s21, 4096, %s184_s3, %s170_s18, %s2897_s14, %s2897_s14, %s2896_s12  }
  0x53   : > { %s221_s1 = scalar_lea.vmem [#allocation8], %s1673_s20  ;;  %p2898_p7 = pneg %p2451_p6 }
  0x54   : > { %s229_s8 = sshll.u32 %s221_s1, 4  ;;  %s2330_s22 = smov [#allocation8]   ;;  %s230_s8 = int_to_ptr.vmem [resolvable:$true] %s229_s8 }
  0x55   : > { %s2160_s5 = scalar_lea.vmem %s230_s8, 32  ;;  %s2165_s26 = sshll.u32 %s2330_s22, 4  ;;  %s2166_s26 = int_to_ptr.vmem [resolvable:$false] %s2165_s26 }
  0x56   : > { %p2161_p8 = scmp.ne.s32.totalorder %s230_s8, %s2160_s5  ;;  %s2167_s10 = scalar_lea.vmem %s2166_s26, 64 }
  0x57   : > { %p2168_p5 = scmp.lt.s32.totalorder %s230_s8, %s2166_s26  ;;  %p2169_p12 = scmp.lt.s32.totalorder %s2167_s10, %s2160_s5 }
  0x58   : > { %p2163_p11 = pnand %p2161_p8, %p2898_p7 }
  0x59   : > { %p2170_p4 = por %p2169_p12, %p2168_p5 }
  0x5a   : > { %p2164_p3 = pneg %p2163_p11 }
  0x5c   : > { %p2171_p2 = pnand %p2170_p4, %p2164_p3 }
  0x5e   : > { %2174 = shalt.err (!%p2171_p2)
}
  0x5f   : > { %1870 = dma.hbm_to_vmem [thread:$0]  (!%p2451_p6), %s2562_s7, 32, %s230_s8, %s2456_s28  }
  0x60   : > { %238 = sbr.rel (%p2471_p10) target bundleno = 445 (0x1bd), region = 32  ;;  %s240_s3 = sand.u32 (!%p2471_p10), 1, %s2299_s19  }
  0x61   : > { %s1677_s20 = sshll.u32 (!%p2471_p10), %s240_s3, 8  ;;  %s241_s15 = scalar_lea.sflag (!%p2471_p10), [#allocation4], %s240_s3 }
  0x62   : > { %s2581_s21 = scalar_lea.vmem (!%p2471_p10), [#allocation3], %s1677_s20 }
  0x65   : > { %2258 = dma.done.wait (%p2505_p1), %s241_s15, 4096  }
  0x66   : > { %2260 = vsyncadd (%p2505_p1), %s241_s15, 4294963200  ;;  %s249_s28 = sand.u32 1, %s2476_s4   ;;  %s251_s11 = sand.u32 1, %s2287_s16  }
  0x67   : > { %s1678_s9 = sshll.u32 %s251_s11, 8  ;;  %s250_s7 = scalar_lea.sflag [#allocation7], %s249_s28 }
  0x68   : > { %s2591_s18 = scalar_lea.vmem [#allocation6], %s1678_s9 }
  0x69   : > { %2262 = dma.done.wait (%p2514_p9), %s250_s7, 4128  }
  0x6a   : > { %2264 = vsyncadd (%p2514_p9), %s250_s7, 4294963168  ;;  %v1995_v0 = vld [vmem:[%s2591_s18 + $0x74] ss:$8 sps:$4 sm:$0xff]   ;;  %v1997_v1 = vld [vmem:[%s2591_s18 + $0x70] ss:$8 sps:$4 sm:$0xff]   ;;  %s1679_s29 = sshll.u32 %s251_s11, 1 }
  0x6b   : > { %818 = vmatprep.subr.bf16.mxu0 %v1995_v0  ;;  %1820 = vmatprep.subr.bf16.mxu1 %v1995_v0  ;;  %v1998_v2 = vld [vmem:[%s2591_s18 + $0x64] ss:$8 sps:$4 sm:$0xff]   ;;  %v2000_v3 = vld [vmem:[%s2591_s18 + $0x60] ss:$8 sps:$4 sm:$0xff]   ;;  %v2001_v4 = vld [vmem:[%s2591_s18 + $0x54] ss:$8 sps:$4 sm:$0xff]   ;;  %v1208_v0 = vlaneseq }
  0x6c   : > { %819 = vmatpush1.bf16.msra.mxu0 %v1997_v1  ;;  %1836 = vmatpush1.bf16.msra.mxu1 %v1997_v1  ;;  %v2003_v5 = vld [vmem:[%s2591_s18 + $0x50] ss:$8 sps:$4 sm:$0xff]   ;;  %v2004_v6 = vld [vmem:[%s2591_s18 + $0x44] ss:$8 sps:$4 sm:$0xff]   ;;  %v2006_v7 = vld [vmem:[%s2591_s18 + $0x40] ss:$8 sps:$4 sm:$0xff]  }
  0x6d   : > { %820 = vmatprep.subr.bf16.mxu0 %v1998_v2  ;;  %1821 = vmatprep.subr.bf16.mxu1 %v1998_v2  ;;  %v2007_v8 = vld [vmem:[%s2591_s18 + $0x34] ss:$8 sps:$4 sm:$0xff]   ;;  %v2009_v9 = vld [vmem:[%s2591_s18 + $0x30] ss:$8 sps:$4 sm:$0xff]   ;;  %v2010_v10 = vld [vmem:[%s2591_s18 + $0x24] ss:$8 sps:$4 sm:$0xff]  }
  0x6e   : > { %v2012_v11 = vld [vmem:[%s2591_s18 + $0x20] ss:$8 sps:$4 sm:$0xff]   ;;  %v2013_v12 = vld [vmem:[%s2591_s18 + $0x14] ss:$8 sps:$4 sm:$0xff]   ;;  %v2045_v13 = vld [vmem:[%s2581_s21 + $0x4] ss:$8 sps:$4 sm:$0xff]  }
  0x6f   : > { %v2015_v14 = vld [vmem:[%s2591_s18 + $0x10] ss:$8 sps:$4 sm:$0xff]   ;;  %v2048_v15 = vld [vmem:[%s2581_s21 + $0x84] ss:$8 sps:$4 sm:$0xff]   ;;  %850 = vmatprep.mubr.bf16.mxu0 %v2045_v13  ;;  %v2018_v17 = vld [vmem:[%s2591_s18] ss:$8 sps:$4 sm:$0xff]  }
  0x70   : > { %821 = vmatpush1.bf16.msra.mxu0 %v2000_v3  ;;  %1837 = vmatpush1.bf16.msra.mxu1 %v2000_v3  ;;  %v2016_v16 = vld [vmem:[%s2591_s18 + $0x4] ss:$8 sps:$4 sm:$0xff]   ;;  %v2019_v18 = vld [vmem:[%s2591_s18 + $0xf4] ss:$8 sps:$4 sm:$0xff]   ;;  %v2021_v19 = vld [vmem:[%s2591_s18 + $0xf0] ss:$8 sps:$4 sm:$0xff]  }
  0x71   : > { %822 = vmatprep.subr.bf16.mxu0 %v2001_v4  ;;  %1822 = vmatprep.subr.bf16.mxu1 %v2001_v4  ;;  %v2022_v20 = vld [vmem:[%s2591_s18 + $0xe4] ss:$8 sps:$4 sm:$0xff]   ;;  %v2024_v21 = vld [vmem:[%s2591_s18 + $0xe0] ss:$8 sps:$4 sm:$0xff]   ;;  %v2025_v22 = vld [vmem:[%s2591_s18 + $0xd4] ss:$8 sps:$4 sm:$0xff]  }
  0x72   : > { %930 = vmatprep.mubr.bf16.mxu1 %v2048_v15  ;;  %v2027_v23 = vld [vmem:[%s2591_s18 + $0xd0] ss:$8 sps:$4 sm:$0xff]   ;;  %v2028_v24 = vld [vmem:[%s2591_s18 + $0xc4] ss:$8 sps:$4 sm:$0xff]   ;;  %v2030_v25 = vld [vmem:[%s2591_s18 + $0xc0] ss:$8 sps:$4 sm:$0xff]  }
  0x73   : > { %v2031_v26 = vld [vmem:[%s2591_s18 + $0xb4] ss:$8 sps:$4 sm:$0xff]   ;;  %v2033_v27 = vld [vmem:[%s2591_s18 + $0xb0] ss:$8 sps:$4 sm:$0xff]   ;;  %v2034_v28 = vld [vmem:[%s2591_s18 + $0xa4] ss:$8 sps:$4 sm:$0xff]  }
  0x74   : > { %823 = vmatpush1.bf16.msra.mxu0 %v2003_v5  ;;  %1838 = vmatpush1.bf16.msra.mxu1 %v2003_v5  ;;  %v2036_v29 = vld [vmem:[%s2591_s18 + $0xa0] ss:$8 sps:$4 sm:$0xff]   ;;  %v2037_v30 = vld [vmem:[%s2591_s18 + $0x94] ss:$8 sps:$4 sm:$0xff]   ;;  %v2039_v31 = vld [vmem:[%s2591_s18 + $0x90] ss:$8 sps:$4 sm:$0xff]  }
  0x75   : > { %824 = vmatprep.subr.bf16.mxu0 %v2004_v6  ;;  %1823 = vmatprep.subr.bf16.mxu1 %v2004_v6  ;;  %v2040_v32 = vld [vmem:[%s2591_s18 + $0x84] ss:$8 sps:$4 sm:$0xff]   ;;  %v2042_v33 = vld [vmem:[%s2591_s18 + $0x80] ss:$8 sps:$4 sm:$0xff]   ;;  %v2049_v36 = vld [vmem:[%s2581_s21 + $0x14] ss:$8 sps:$4 sm:$0xff]  }
  0x76   : > { %v2043_v34 = vld [vmem:[%s2581_s21] ss:$8 sps:$4 sm:$0xff]   ;;  %v2051_v37 = vld [vmem:[%s2581_s21 + $0x94] ss:$8 sps:$4 sm:$0xff]   ;;  %v2053_v38 = vld [vmem:[%s2581_s21 + $0x10] ss:$8 sps:$4 sm:$0xff]  }
  0x77   : > { %v2046_v35 = vld [vmem:[%s2581_s21 + $0x80] ss:$8 sps:$4 sm:$0xff]   ;;  %v2054_v39 = vld [vmem:[%s2581_s21 + $0x90] ss:$8 sps:$4 sm:$0xff]   ;;  %v2055_v40 = vld [vmem:[%s2581_s21 + $0x24] ss:$8 sps:$4 sm:$0xff]  }
  0x78   : > { %825 = vmatpush1.bf16.msra.mxu0 %v2006_v7  ;;  %1839 = vmatpush1.bf16.msra.mxu1 %v2006_v7  ;;  %v2057_v41 = vld [vmem:[%s2581_s21 + $0xa4] ss:$8 sps:$4 sm:$0xff]   ;;  %v2059_v42 = vld [vmem:[%s2581_s21 + $0x20] ss:$8 sps:$4 sm:$0xff]   ;;  %v2061_v44 = vld [vmem:[%s2581_s21 + $0x34] ss:$8 sps:$4 sm:$0xff]  }
  0x79   : > { %826 = vmatprep.subr.bf16.mxu0 %v2007_v8  ;;  %1824 = vmatprep.subr.bf16.mxu1 %v2007_v8  ;;  %v2060_v43 = vld [vmem:[%s2581_s21 + $0xa0] ss:$8 sps:$4 sm:$0xff]   ;;  %v2063_v45 = vld [vmem:[%s2581_s21 + $0xb4] ss:$8 sps:$4 sm:$0xff]   ;;  %v2065_v46 = vld [vmem:[%s2581_s21 + $0x30] ss:$8 sps:$4 sm:$0xff]  }
  0x7a   : > { %v2066_v47 = vld [vmem:[%s2581_s21 + $0xb0] ss:$8 sps:$4 sm:$0xff]   ;;  %v2067_v48 = vld [vmem:[%s2581_s21 + $0x44] ss:$8 sps:$4 sm:$0xff]   ;;  %v2071_v50 = vld [vmem:[%s2581_s21 + $0x40] ss:$8 sps:$4 sm:$0xff]  }
  0x7b   : > { %v2069_v49 = vld [vmem:[%s2581_s21 + $0xc4] ss:$8 sps:$4 sm:$0xff]   ;;  %v2072_v51 = vld [vmem:[%s2581_s21 + $0xc0] ss:$8 sps:$4 sm:$0xff]   ;;  %v2073_v52 = vld [vmem:[%s2581_s21 + $0x54] ss:$8 sps:$4 sm:$0xff]  }
  0x7c   : > { %827 = vmatpush1.bf16.msra.mxu0 %v2009_v9  ;;  %1840 = vmatpush1.bf16.msra.mxu1 %v2009_v9  ;;  %v2075_v53 = vld [vmem:[%s2581_s21 + $0xd4] ss:$8 sps:$4 sm:$0xff]   ;;  %v2077_v54 = vld [vmem:[%s2581_s21 + $0x50] ss:$8 sps:$4 sm:$0xff]   ;;  %v2079_v56 = vld [vmem:[%s2581_s21 + $0x64] ss:$8 sps:$4 sm:$0xff]  }
  0x7d   : > { %828 = vmatprep.subr.bf16.mxu0 %v2010_v10  ;;  %1825 = vmatprep.subr.bf16.mxu1 %v2010_v10  ;;  %v2078_v55 = vld [vmem:[%s2581_s21 + $0xd0] ss:$8 sps:$4 sm:$0xff]   ;;  %v2081_v57 = vld [vmem:[%s2581_s21 + $0xe4] ss:$8 sps:$4 sm:$0xff]   ;;  %v2083_v58 = vld [vmem:[%s2581_s21 + $0x60] ss:$8 sps:$4 sm:$0xff]  }
  0x7e   : > { %v2084_v59 = vld [vmem:[%s2581_s21 + $0xe0] ss:$8 sps:$4 sm:$0xff]   ;;  %v2085_v60 = vld [vmem:[%s2581_s21 + $0x74] ss:$8 sps:$4 sm:$0xff]   ;;  %v2089_v62 = vld [vmem:[%s2581_s21 + $0x70] ss:$8 sps:$4 sm:$0xff]  }
  0x7f   : > { %v2087_v61 = vld [vmem:[%s2581_s21 + $0xf4] ss:$8 sps:$4 sm:$0xff]   ;;  %v2090_v63 = vld [vmem:[%s2581_s21 + $0xf0] ss:$8 sps:$4 sm:$0xff]   ;;  %v1209_v1 = vshrl.u32 %v1208_v0, 7  ;;  %s262_s4 = scalar_lea.vmem [#allocation8], %s1679_s29 }
  0x80   : > { %829 = vmatpush1.bf16.msra.mxu0 %v2012_v11  ;;  %1841 = vmatpush1.bf16.msra.mxu1 %v2012_v11  ;;  %v1206_v4 = vld [vmem:[%s262_s4] sm:$0x3]  ;;  %s292_s27 = sand.u32 1, %s2275_s13   ;;  %s2899_s14 = sld [smem:[#allocation17_spill]] }
  0x81   : > { %830 = vmatprep.subr.bf16.mxu0 %v2013_v12  ;;  %1826 = vmatprep.subr.bf16.mxu1 %v2013_v12  ;;  %v1210_v2 = vsub.s32 0, %v1209_v1  ;;  %v1214_v3 = vsub.s32 1, %v1209_v1  ;;  %s1680_s30 = sshll.u32 %s292_s27, 8  ;;  %s2900_s1 = sld [smem:[#allocation16_spill]] }
  0x82   : > { %s2674_s12 = scalar_lea.vmem [#allocation9], %s1680_s30  ;;  %s2901_s15 = sld [smem:[#allocation25_spill]] }
  0x83   : > { %v2664_v5 = vrot.slane %v1206_v4, %v1210_v2  ;;  %v2666_v6 = vrot.slane %v1206_v4, %v1214_v3  ;;  %s1523_s10 = sshll.u32 %s2674_s12, 4  ;;  %s2780_s11 = scalar_lea.sflag [#allocation5], %s292_s27  ;;  %s2774_s10 = int_to_ptr.vmem [resolvable:$true] %s1523_s10 }
  0x84   : > { %831 = vmatpush1.bf16.msra.mxu0 %v2015_v14  ;;  %1842 = vmatpush1.bf16.msra.mxu1 %v2015_v14  ;;  %s2175_s9 = scalar_lea.vmem %s2774_s10, 4096  ;;  %p2903_p10 = scmp.ne.s32.totalorder %s2891_s6, 0 }
  0x85   : > { %832 = vmatprep.subr.bf16.mxu0 %v2016_v16  ;;  %1827 = vmatprep.subr.bf16.mxu1 %v2016_v16  ;;  %p2176_p6 = scmp.ne.s32.totalorder %s2774_s10, %s2175_s9  ;;  %s2331_s7 = smov [#allocation9]  }
  0x86   : > { %s1852_s8 = smul.u32 192, %s2899_s14  ;;  %s2179_s18 = sshll.u32 %s2331_s7, 4  ;;  %s2180_s18 = int_to_ptr.vmem [resolvable:$false] %s2179_s18 }
  0x87   : > { %s1779_s5 = sshll.u32 %s2900_s1, 1  ;;  %p2177_p1 = pnand %p2176_p6, %p2903_p10 }
  0x88   : > { %833 = vmatpush1.bf16.msra.mxu0 %v2018_v17  ;;  %1843 = vmatpush1.bf16.msra.mxu1 %v2018_v17  ;;  %s1520_s22 = sadd.s32 %s1852_s8, %s1779_s5  ;;  %s2902_s28 = smov %s2901_s15 }
  0x89   : > { %834 = vmatprep.subr.bf16.mxu0 %v2019_v18  ;;  %1828 = vmatprep.subr.bf16.mxu1 %v2019_v18  ;;  %s1781_s26 = sshll.u32 %s1520_s22, 6  ;;  %p2178_p9 = pneg %p2177_p1 }
  0x8a   : > { %s2772_s21 = scalar_lea.hbm %s2901_s15, %s1781_s26  ;;  %s2181_s29 = scalar_lea.vmem %s2180_s18, 8192 }
  0x8b   : > { %p2182_p3 = scmp.lt.s32.totalorder %s2774_s10, %s2180_s18  ;;  %p2183_p0 = scmp.lt.s32.totalorder %s2181_s29, %s2175_s9 }
  0x8c   : > { %835 = vmatpush2.bf16.msra.mxu0 %v2021_v19  ;;  %1844 = vmatpush2.bf16.msra.mxu1 %v2021_v19 }
  0x8d   : > { %836 = vmatprep.subr.bf16.mxu0 %v2022_v20  ;;  %1829 = vmatprep.subr.bf16.mxu1 %v2022_v20  ;;  %p2184_p13 = por %p2183_p0, %p2182_p3 }
  0x8f   : > { %p2185_p8 = pnand %p2184_p13, %p2178_p9 }
  0x90   : > { %837 = vmatpush2.bf16.msra.mxu0 %v2024_v21  ;;  %1845 = vmatpush2.bf16.msra.mxu1 %v2024_v21 }
  0x91   : > { %838 = vmatprep.subr.bf16.mxu0 %v2025_v22  ;;  %1830 = vmatprep.subr.bf16.mxu1 %v2025_v22 }
  0x94   : > { %839 = vmatpush2.bf16.msra.mxu0 %v2027_v23  ;;  %1846 = vmatpush2.bf16.msra.mxu1 %v2027_v23 }
  0x95   : > { %840 = vmatprep.subr.bf16.mxu0 %v2028_v24  ;;  %1831 = vmatprep.subr.bf16.mxu1 %v2028_v24 }
  0x98   : > { %841 = vmatpush2.bf16.msra.mxu0 %v2030_v25  ;;  %1847 = vmatpush2.bf16.msra.mxu1 %v2030_v25 }
  0x99   : > { %842 = vmatprep.subr.bf16.mxu0 %v2031_v26  ;;  %1832 = vmatprep.subr.bf16.mxu1 %v2031_v26 }
  0x9c   : > { %843 = vmatpush2.bf16.msra.mxu0 %v2033_v27  ;;  %1848 = vmatpush2.bf16.msra.mxu1 %v2033_v27 }
  0x9d   : > { %844 = vmatprep.subr.bf16.mxu0 %v2034_v28  ;;  %1833 = vmatprep.subr.bf16.mxu1 %v2034_v28 }
  0xa0   : > { %845 = vmatpush2.bf16.msra.mxu0 %v2036_v29  ;;  %1849 = vmatpush2.bf16.msra.mxu1 %v2036_v29 }
  0xa1   : > { %846 = vmatprep.subr.bf16.mxu0 %v2037_v30  ;;  %1834 = vmatprep.subr.bf16.mxu1 %v2037_v30 }
  0xa4   : > { %847 = vmatpush2.bf16.msra.mxu0 %v2039_v31  ;;  %1850 = vmatpush2.bf16.msra.mxu1 %v2039_v31 }
  0xa5   : > { %848 = vmatprep.subr.bf16.mxu0 %v2040_v32  ;;  %1835 = vmatprep.subr.bf16.mxu1 %v2040_v32 }
  0xa8   : > { %849 = vmatpush2.bf16.msra.mxu0 %v2042_v33  ;;  %1851 = vmatpush2.bf16.msra.mxu1 %v2042_v33 }
  0xab   : > { %851 = vmatmul.mubr.bf16.vlgmr.msra.gmra.mxu0 %v2043_v34  ;;  %931 = vmatmul.mubr.bf16.vlgmr.msra.gmra.mxu1 %v2046_v35 }
  0xac   : > { %860 = vmatprep.mubr.bf16.mxu0 %v2049_v36  ;;  %940 = vmatprep.mubr.bf16.mxu1 %v2051_v37 }
  0xb3   : > { %861 = vmatmul.mubr.bf16.gmra.mxu0 %v2053_v38  ;;  %941 = vmatmul.mubr.bf16.gmra.mxu1 %v2054_v39 }
  0xb4   : > { %870 = vmatprep.mubr.bf16.mxu0 %v2055_v40  ;;  %950 = vmatprep.mubr.bf16.mxu1 %v2057_v41 }
  0xbb   : > { %871 = vmatmul.mubr.bf16.gmra.mxu0 %v2059_v42  ;;  %951 = vmatmul.mubr.bf16.gmra.mxu1 %v2060_v43 }
  0xbc   : > { %880 = vmatprep.mubr.bf16.mxu0 %v2061_v44  ;;  %960 = vmatprep.mubr.bf16.mxu1 %v2063_v45 }
  0xc3   : > { %881 = vmatmul.mubr.bf16.gmra.mxu0 %v2065_v46  ;;  %961 = vmatmul.mubr.bf16.gmra.mxu1 %v2066_v47 }
  0xc4   : > { %890 = vmatprep.mubr.bf16.mxu0 %v2067_v48  ;;  %970 = vmatprep.mubr.bf16.mxu1 %v2069_v49 }
  0xcb   : > { %891 = vmatmul.mubr.bf16.gmra.mxu0 %v2071_v50  ;;  %971 = vmatmul.mubr.bf16.gmra.mxu1 %v2072_v51 }
  0xcc   : > { %900 = vmatprep.mubr.bf16.mxu0 %v2073_v52  ;;  %980 = vmatprep.mubr.bf16.mxu1 %v2075_v53 }
  0xd3   : > { %901 = vmatmul.mubr.bf16.gmra.mxu0 %v2077_v54  ;;  %981 = vmatmul.mubr.bf16.gmra.mxu1 %v2078_v55 }
  0xd4   : > { %910 = vmatprep.mubr.bf16.mxu0 %v2079_v56  ;;  %990 = vmatprep.mubr.bf16.mxu1 %v2081_v57 }
  0xdb   : > { %911 = vmatmul.mubr.bf16.gmra.mxu0 %v2083_v58  ;;  %991 = vmatmul.mubr.bf16.gmra.mxu1 %v2084_v59 }
  0xdc   : > { %920 = vmatprep.mubr.bf16.mxu0 %v2085_v60  ;;  %1000 = vmatprep.mubr.bf16.mxu1 %v2087_v61 }
  0xe3   : > { %921 = vmatmul.mubr.bf16.gmra.mxu0 %v2089_v62  ;;  %1001 = vmatmul.mubr.bf16.gmra.mxu1 %v2090_v63 }
 0x16b   : > { %v852_v7 = vpop.f32.mrf.mxu0  ;;  %v932_v8 = vpop.f32.mrf.mxu1 }
 0x16c   : > { %v1218_v11 = vadd.f32 %v2664_v5, %v852_v7  ;;  %v1250_v12 = vadd.f32 %v2664_v5, %v932_v8 }
 0x16d   : > { %v854_v9 = vpop.f32.mrf.mxu0  ;;  %v934_v10 = vpop.f32.mrf.mxu1 }
 0x16e   : > { %v1219_v13 = vadd.f32 %v2666_v6, %v854_v9  ;;  %v1251_v14 = vadd.f32 %v2666_v6, %v934_v10 }
 0x16f   : > { %v856_v15 = vpop.f32.mrf.mxu0  ;;  %v936_v16 = vpop.f32.mrf.mxu1 }
 0x170   : > { %v1788_v17 = vpack.c.bf16 %v1219_v13, %v1218_v11  ;;  %v1804_v18 = vpack.c.bf16 %v1251_v14, %v1250_v12  ;;  %v1220_v21 = vadd.f32 %v2664_v5, %v856_v15  ;;  %v1252_v22 = vadd.f32 %v2664_v5, %v936_v16 }
 0x171   : > { %v858_v19 = vpop.f32.mrf.mxu0  ;;  %v938_v20 = vpop.f32.mrf.mxu1 }
 0x172   : > { %1474 = vst [vmem:[%s2674_s12] sm:$0xff] %v1788_v17  ;;  %1490 = vst [vmem:[%s2674_s12 + $0x80] sm:$0xff] %v1804_v18  ;;  %v1221_v23 = vadd.f32 %v2666_v6, %v858_v19  ;;  %v1253_v24 = vadd.f32 %v2666_v6, %v938_v20 }
 0x173   : > { %v862_v25 = vpop.f32.mrf.mxu0  ;;  %v942_v26 = vpop.f32.mrf.mxu1 }
 0x174   : > { %v1789_v27 = vpack.c.bf16 %v1221_v23, %v1220_v21  ;;  %v1805_v28 = vpack.c.bf16 %v1253_v24, %v1252_v22  ;;  %v1222_v31 = vadd.f32 %v2664_v5, %v862_v25  ;;  %v1254_v32 = vadd.f32 %v2664_v5, %v942_v26 }
 0x175   : > { %v864_v29 = vpop.f32.mrf.mxu0  ;;  %v944_v30 = vpop.f32.mrf.mxu1 }
 0x176   : > { %1475 = vst [vmem:[%s2674_s12 + $0x8] sm:$0xff] %v1789_v27  ;;  %1491 = vst [vmem:[%s2674_s12 + $0x88] sm:$0xff] %v1805_v28  ;;  %v1223_v33 = vadd.f32 %v2666_v6, %v864_v29  ;;  %v1255_v34 = vadd.f32 %v2666_v6, %v944_v30 }
 0x177   : > { %v866_v35 = vpop.f32.mrf.mxu0  ;;  %v946_v36 = vpop.f32.mrf.mxu1 }
 0x178   : > { %v1790_v37 = vpack.c.bf16 %v1223_v33, %v1222_v31  ;;  %v1806_v38 = vpack.c.bf16 %v1255_v34, %v1254_v32  ;;  %v1224_v41 = vadd.f32 %v2664_v5, %v866_v35  ;;  %v1256_v42 = vadd.f32 %v2664_v5, %v946_v36 }
 0x179   : > { %v868_v39 = vpop.f32.mrf.mxu0  ;;  %v948_v40 = vpop.f32.mrf.mxu1 }
 0x17a   : > { %1476 = vst [vmem:[%s2674_s12 + $0x10] sm:$0xff] %v1790_v37  ;;  %1492 = vst [vmem:[%s2674_s12 + $0x90] sm:$0xff] %v1806_v38  ;;  %v1225_v43 = vadd.f32 %v2666_v6, %v868_v39  ;;  %v1257_v44 = vadd.f32 %v2666_v6, %v948_v40 }
 0x17b   : > { %v872_v45 = vpop.f32.mrf.mxu0  ;;  %v952_v46 = vpop.f32.mrf.mxu1 }
 0x17c   : > { %v1791_v47 = vpack.c.bf16 %v1225_v43, %v1224_v41  ;;  %v1807_v48 = vpack.c.bf16 %v1257_v44, %v1256_v42  ;;  %v1226_v51 = vadd.f32 %v2664_v5, %v872_v45  ;;  %v1258_v52 = vadd.f32 %v2664_v5, %v952_v46 }
 0x17d   : > { %v874_v49 = vpop.f32.mrf.mxu0  ;;  %v954_v50 = vpop.f32.mrf.mxu1 }
 0x17e   : > { %1477 = vst [vmem:[%s2674_s12 + $0x18] sm:$0xff] %v1791_v47  ;;  %1493 = vst [vmem:[%s2674_s12 + $0x98] sm:$0xff] %v1807_v48  ;;  %v1227_v53 = vadd.f32 %v2666_v6, %v874_v49  ;;  %v1259_v54 = vadd.f32 %v2666_v6, %v954_v50 }
 0x17f   : > { %v876_v55 = vpop.f32.mrf.mxu0  ;;  %v956_v56 = vpop.f32.mrf.mxu1 }
 0x180   : > { %v1792_v57 = vpack.c.bf16 %v1227_v53, %v1226_v51  ;;  %v1808_v58 = vpack.c.bf16 %v1259_v54, %v1258_v52  ;;  %v1228_v61 = vadd.f32 %v2664_v5, %v876_v55  ;;  %v1260_v62 = vadd.f32 %v2664_v5, %v956_v56 }
 0x181   : > { %v878_v59 = vpop.f32.mrf.mxu0  ;;  %v958_v60 = vpop.f32.mrf.mxu1 }
 0x182   : > { %1478 = vst [vmem:[%s2674_s12 + $0x20] sm:$0xff] %v1792_v57  ;;  %1494 = vst [vmem:[%s2674_s12 + $0xa0] sm:$0xff] %v1808_v58  ;;  %v1229_v63 = vadd.f32 %v2666_v6, %v878_v59  ;;  %v1261_v0 = vadd.f32 %v2666_v6, %v958_v60 }
 0x183   : > { %v882_v1 = vpop.f32.mrf.mxu0  ;;  %v962_v2 = vpop.f32.mrf.mxu1 }
 0x184   : > { %v1793_v3 = vpack.c.bf16 %v1229_v63, %v1228_v61  ;;  %v1809_v4 = vpack.c.bf16 %v1261_v0, %v1260_v62  ;;  %v1230_v9 = vadd.f32 %v2664_v5, %v882_v1  ;;  %v1262_v10 = vadd.f32 %v2664_v5, %v962_v2 }
 0x185   : > { %v884_v7 = vpop.f32.mrf.mxu0  ;;  %v964_v8 = vpop.f32.mrf.mxu1 }
 0x186   : > { %1479 = vst [vmem:[%s2674_s12 + $0x28] sm:$0xff] %v1793_v3  ;;  %1495 = vst [vmem:[%s2674_s12 + $0xa8] sm:$0xff] %v1809_v4  ;;  %v1231_v11 = vadd.f32 %v2666_v6, %v884_v7  ;;  %v1263_v12 = vadd.f32 %v2666_v6, %v964_v8 }
 0x187   : > { %v886_v13 = vpop.f32.mrf.mxu0  ;;  %v966_v14 = vpop.f32.mrf.mxu1 }
 0x188   : > { %v1794_v15 = vpack.c.bf16 %v1231_v11, %v1230_v9  ;;  %v1810_v16 = vpack.c.bf16 %v1263_v12, %v1262_v10  ;;  %v1232_v19 = vadd.f32 %v2664_v5, %v886_v13  ;;  %v1264_v20 = vadd.f32 %v2664_v5, %v966_v14 }
 0x189   : > { %v888_v17 = vpop.f32.mrf.mxu0  ;;  %v968_v18 = vpop.f32.mrf.mxu1 }
 0x18a   : > { %1480 = vst [vmem:[%s2674_s12 + $0x30] sm:$0xff] %v1794_v15  ;;  %1496 = vst [vmem:[%s2674_s12 + $0xb0] sm:$0xff] %v1810_v16  ;;  %v1233_v21 = vadd.f32 %v2666_v6, %v888_v17  ;;  %v1265_v22 = vadd.f32 %v2666_v6, %v968_v18 }
 0x18b   : > { %v892_v23 = vpop.f32.mrf.mxu0  ;;  %v972_v24 = vpop.f32.mrf.mxu1 }
 0x18c   : > { %v1795_v25 = vpack.c.bf16 %v1233_v21, %v1232_v19  ;;  %v1811_v26 = vpack.c.bf16 %v1265_v22, %v1264_v20  ;;  %v1234_v29 = vadd.f32 %v2664_v5, %v892_v23  ;;  %v1266_v30 = vadd.f32 %v2664_v5, %v972_v24 }
 0x18d   : > { %v894_v27 = vpop.f32.mrf.mxu0  ;;  %v974_v28 = vpop.f32.mrf.mxu1 }
 0x18e   : > { %1481 = vst [vmem:[%s2674_s12 + $0x38] sm:$0xff] %v1795_v25  ;;  %1497 = vst [vmem:[%s2674_s12 + $0xb8] sm:$0xff] %v1811_v26  ;;  %v1235_v31 = vadd.f32 %v2666_v6, %v894_v27  ;;  %v1267_v32 = vadd.f32 %v2666_v6, %v974_v28 }
 0x18f   : > { %v896_v33 = vpop.f32.mrf.mxu0  ;;  %v976_v34 = vpop.f32.mrf.mxu1 }
 0x190   : > { %v1796_v35 = vpack.c.bf16 %v1235_v31, %v1234_v29  ;;  %v1812_v36 = vpack.c.bf16 %v1267_v32, %v1266_v30  ;;  %v1236_v39 = vadd.f32 %v2664_v5, %v896_v33  ;;  %v1268_v40 = vadd.f32 %v2664_v5, %v976_v34 }
 0x191   : > { %v898_v37 = vpop.f32.mrf.mxu0  ;;  %v978_v38 = vpop.f32.mrf.mxu1 }
 0x192   : > { %1482 = vst [vmem:[%s2674_s12 + $0x40] sm:$0xff] %v1796_v35  ;;  %1498 = vst [vmem:[%s2674_s12 + $0xc0] sm:$0xff] %v1812_v36  ;;  %v1237_v41 = vadd.f32 %v2666_v6, %v898_v37  ;;  %v1269_v42 = vadd.f32 %v2666_v6, %v978_v38 }
 0x193   : > { %v902_v43 = vpop.f32.mrf.mxu0  ;;  %v982_v44 = vpop.f32.mrf.mxu1 }
 0x194   : > { %v1797_v45 = vpack.c.bf16 %v1237_v41, %v1236_v39  ;;  %v1813_v46 = vpack.c.bf16 %v1269_v42, %v1268_v40  ;;  %v1238_v49 = vadd.f32 %v2664_v5, %v902_v43  ;;  %v1270_v50 = vadd.f32 %v2664_v5, %v982_v44 }
 0x195   : > { %v904_v47 = vpop.f32.mrf.mxu0  ;;  %v984_v48 = vpop.f32.mrf.mxu1 }
 0x196   : > { %1483 = vst [vmem:[%s2674_s12 + $0x48] sm:$0xff] %v1797_v45  ;;  %1499 = vst [vmem:[%s2674_s12 + $0xc8] sm:$0xff] %v1813_v46  ;;  %v1239_v51 = vadd.f32 %v2666_v6, %v904_v47  ;;  %v1271_v52 = vadd.f32 %v2666_v6, %v984_v48 }
 0x197   : > { %v906_v53 = vpop.f32.mrf.mxu0  ;;  %v986_v54 = vpop.f32.mrf.mxu1 }
 0x198   : > { %v1798_v55 = vpack.c.bf16 %v1239_v51, %v1238_v49  ;;  %v1814_v56 = vpack.c.bf16 %v1271_v52, %v1270_v50  ;;  %v1240_v59 = vadd.f32 %v2664_v5, %v906_v53  ;;  %v1272_v60 = vadd.f32 %v2664_v5, %v986_v54 }
 0x199   : > { %v908_v57 = vpop.f32.mrf.mxu0  ;;  %v988_v58 = vpop.f32.mrf.mxu1 }
 0x19a   : > { %1484 = vst [vmem:[%s2674_s12 + $0x50] sm:$0xff] %v1798_v55  ;;  %1500 = vst [vmem:[%s2674_s12 + $0xd0] sm:$0xff] %v1814_v56  ;;  %v1241_v61 = vadd.f32 %v2666_v6, %v908_v57  ;;  %v1273_v62 = vadd.f32 %v2666_v6, %v988_v58 }
 0x19b   : > { %v912_v63 = vpop.f32.mrf.mxu0  ;;  %v992_v0 = vpop.f32.mrf.mxu1 }
 0x19c   : > { %v1799_v1 = vpack.c.bf16 %v1241_v61, %v1240_v59  ;;  %v1815_v2 = vpack.c.bf16 %v1273_v62, %v1272_v60  ;;  %v1242_v7 = vadd.f32 %v2664_v5, %v912_v63  ;;  %v1274_v8 = vadd.f32 %v2664_v5, %v992_v0 }
 0x19d   : > { %v914_v3 = vpop.f32.mrf.mxu0  ;;  %v994_v4 = vpop.f32.mrf.mxu1 }
 0x19e   : > { %1485 = vst [vmem:[%s2674_s12 + $0x58] sm:$0xff] %v1799_v1  ;;  %1501 = vst [vmem:[%s2674_s12 + $0xd8] sm:$0xff] %v1815_v2  ;;  %v1243_v9 = vadd.f32 %v2666_v6, %v914_v3  ;;  %v1275_v10 = vadd.f32 %v2666_v6, %v994_v4 }
 0x19f   : > { %v916_v11 = vpop.f32.mrf.mxu0  ;;  %v996_v12 = vpop.f32.mrf.mxu1 }
 0x1a0   : > { %v1800_v13 = vpack.c.bf16 %v1243_v9, %v1242_v7  ;;  %v1816_v14 = vpack.c.bf16 %v1275_v10, %v1274_v8  ;;  %v1244_v17 = vadd.f32 %v2664_v5, %v916_v11  ;;  %v1276_v18 = vadd.f32 %v2664_v5, %v996_v12 }
 0x1a1   : > { %v918_v15 = vpop.f32.mrf.mxu0  ;;  %v998_v16 = vpop.f32.mrf.mxu1 }
 0x1a2   : > { %1486 = vst [vmem:[%s2674_s12 + $0x60] sm:$0xff] %v1800_v13  ;;  %1502 = vst [vmem:[%s2674_s12 + $0xe0] sm:$0xff] %v1816_v14  ;;  %v1245_v19 = vadd.f32 %v2666_v6, %v918_v15  ;;  %v1277_v20 = vadd.f32 %v2666_v6, %v998_v16 }
 0x1a3   : > { %v922_v21 = vpop.f32.mrf.mxu0  ;;  %v1002_v22 = vpop.f32.mrf.mxu1 }
 0x1a4   : > { %v1801_v23 = vpack.c.bf16 %v1245_v19, %v1244_v17  ;;  %v1817_v24 = vpack.c.bf16 %v1277_v20, %v1276_v18  ;;  %v1246_v27 = vadd.f32 %v2664_v5, %v922_v21  ;;  %v1278_v28 = vadd.f32 %v2664_v5, %v1002_v22 }
 0x1a5   : > { %v924_v25 = vpop.f32.mrf.mxu0  ;;  %v1004_v26 = vpop.f32.mrf.mxu1 }
 0x1a6   : > { %1487 = vst [vmem:[%s2674_s12 + $0x68] sm:$0xff] %v1801_v23  ;;  %1503 = vst [vmem:[%s2674_s12 + $0xe8] sm:$0xff] %v1817_v24  ;;  %v1247_v29 = vadd.f32 %v2666_v6, %v924_v25  ;;  %v1279_v30 = vadd.f32 %v2666_v6, %v1004_v26 }
 0x1a7   : > { %v926_v31 = vpop.f32.mrf.mxu0  ;;  %v1006_v32 = vpop.f32.mrf.mxu1 }
 0x1a8   : > { %v1802_v33 = vpack.c.bf16 %v1247_v29, %v1246_v27  ;;  %v1818_v34 = vpack.c.bf16 %v1279_v30, %v1278_v28  ;;  %v1248_v37 = vadd.f32 %v2664_v5, %v926_v31  ;;  %v1280_v38 = vadd.f32 %v2664_v5, %v1006_v32 }
 0x1a9   : > { %v928_v35 = vpop.f32.mrf.mxu0  ;;  %v1008_v36 = vpop.f32.mrf.mxu1 }
 0x1aa   : > { %1488 = vst [vmem:[%s2674_s12 + $0x70] sm:$0xff] %v1802_v33  ;;  %1504 = vst [vmem:[%s2674_s12 + $0xf0] sm:$0xff] %v1818_v34  ;;  %v1249_v39 = vadd.f32 %v2666_v6, %v928_v35  ;;  %v1281_v40 = vadd.f32 %v2666_v6, %v1008_v36 }
 0x1ac   : > { %v1803_v41 = vpack.c.bf16 %v1249_v39, %v1248_v37  ;;  %v1819_v42 = vpack.c.bf16 %v1281_v40, %v1280_v38 }
 0x1ae   : > { %1489 = vst [vmem:[%s2674_s12 + $0x78] sm:$0xff] %v1803_v41  ;;  %1505 = vst [vmem:[%s2674_s12 + $0xf8] sm:$0xff] %v1819_v42 }
 0x1af   : > { %2188 = shalt.err (!%p2185_p8)
}
 0x1b0   : > { %s2189_s4 = scalar_lea.hbm %s2772_s21, 4096  ;;  %s2193_s12 = scalar_lea.hbm %s2902_s28, 24576 }
 0x1b1   : > { %p2190_p7 = scmp.ne.s32.totalorder %s2772_s21, %s2189_s4  ;;  %p2194_p12 = scmp.lt.s32.totalorder %s2772_s21, %s2902_s28 }
 0x1b2   : > { %p2195_p4 = scmp.lt.s32.totalorder %s2193_s12, %s2189_s4 }
 0x1b3   : > { %p2191_p11 = pnand %p2190_p7, %p2903_p10 }
 0x1b4   : > { %p2196_p2 = por %p2195_p4, %p2194_p12 }
 0x1b5   : > { %p2192_p5 = pneg %p2191_p11 }
 0x1b7   : > { %p2197_p6 = pnand %p2196_p2, %p2192_p5 }
 0x1b9   : > { %2200 = shalt.err (!%p2197_p6)
}
 0x1ba   : > { %s2332_s8 = smov 128   ;;  %s2333_s5 = smov 384  }
 0x1bb   : > { %s2334_s22 = smov 8  }
 0x1bc   : > { %1859 = dma.vmem_to_hbm [thread:$0]  (%p2903_p10), %s2774_s10, 4096, %s2772_s21, %s2780_s11, %s2332_s8, %s2333_s5, %s2334_s22  }
 0x1bd PF: > { %s2904_s26 = sld [smem:[#allocation13_spill]]  ;;  %p1876_p1 = scmp.ge.s32.totalorder %s2323_s25, 2 }
 0x1be   : > { %s2905_s3 = sld [smem:[#allocation23_spill]] }
 0x1c3   : > { %s1538_s20 = sand.u32 1, %s2904_s26  }
 0x1c4   : > { %p2906_p9 = scmp.ne.s32.totalorder %s2905_s3, 0  ;;  %s1539_s15 = scalar_lea.sflag [#allocation5], %s1538_s20 }
 0x1c6   : > { %p1872_p3 = pnand %p1876_p1, %p2906_p9 }
 0x1c8   : > { %p1873_p0 = pneg %p1872_p3 }
 0x1ca   : > { %2266 = dma.done.wait (%p1873_p0), %s1539_s15, 4096  }
 0x1cb   : > { %2268 = vsyncadd (%p1873_p0), %s1539_s15, 4294963200  ;;  %s22_s25 = sadd.s32 1, %s2323_s25   ;;  %s2908_s6 = sld [smem:[#allocation14_spill]] }
 0x1cc   : > { %p2808_p13 = scmp.ge.s32.totalorder %s22_s25, 8   ;;  %s2909_s14 = sld [smem:[#allocation22_spill]] }
 0x1cd   : > { %s2910_s10 = sld [smem:[#allocation20_spill]]  ;;  %s2915_s12 = smov %s2275_s13 }
 0x1ce   : > { %s2911_s21 = sld [smem:[#allocation15_spill]]  ;;  %s2917_s15 = smov %s2287_s16 }
 0x1cf   : > { %s2912_s20 = sld [smem:[#allocation21_spill]]  ;;  %s2918_s16 = smov %s2291_s17 }
 0x1d0   : > { %s2913_s11 = sld [smem:[#allocation18_spill]]  ;;  %s2920_s18 = smov %s2299_s19 }
 0x1d1   : > { %s2914_s7 = sld [smem:[#allocation19_spill]]  ;;  %s2916_s13 = smov %s2908_s6 }
 0x1d2   : > { %s2923_s22 = smov %s2319_s24 }
 0x1d3   : > { %s2919_s17 = smov %s2910_s10  ;;  %21 = sbr.rel (!%p2808_p13) target bundleno = 15 (0xf), region = 109 }
 0x1d4   : > { %s2921_s19 = smov %s2911_s21  ;;  %s2922_s21 = smov %s2315_s23 }
 0x1d6   : > { %s2924_s23 = smov %s2913_s11 }
 0x1d7   : > { %s2925_s24 = smov %s2914_s7 }
 0x1d8   :  { %1544 = vsyncpa [#allocation4], 1 }
 0x1d9   :  { %1546 = vsyncpa [#allocation4 + $0x1], 1 }
 0x1da   :  { %1547 = vsyncpa [#allocation7], 1 }
 0x1db   :  { %1549 = vsyncpa [#allocation7 + $0x1], 1 }
 0x1dc   :  { %1550 = vsyncpa [#allocation5], 1 }
 0x1dd   :  { %1552 = vsyncpa [#allocation5 + $0x1], 1 }

</bundles_post_ra>
